<compile_context>
chip_gen: v5e
topology: v5e:2x2
jax: 0.10.0
libtpu: 0.0.40
codegen_flags: <defaults>
</compile_context>

<pallas_src>
import math
import numpy as np
import jax
import jax.numpy as jnp
from jax import lax
from jax.experimental import pallas as pl
from jax.experimental.pallas import tpu as pltpu


# ----------------------------------------------------------------------------
# Pallas kernel: one (batch row, layer) grid point of the fused encoder stack.
# ----------------------------------------------------------------------------
def make_encoder_kernel(num_layers, heads, head_dim, embed_size, eps=1e-5):
    scale = 1.0 / math.sqrt(float(embed_size))   # reference scales by 1/sqrt(E)

    def kernel(x_ref, bias_ref,
               wq_ref, wk_ref, wv_ref, wo_ref, wf1_ref, wf2_ref,
               vec_e_ref, bf1_ref,
               out_ref, res_ref):
        layer = pl.program_id(1)

        # Initialize the resident residual stream from the embeddings once per batch.
        @pl.when(layer == 0)
        def _():
            res_ref[...] = x_ref[0]                    # (S, E) f32

        x = res_ref[...]                               # (S, E) f32 residual stream
        bias = bias_ref[0]                             # (1, S) additive mask bias

        x_b = x.astype(jnp.bfloat16)
        wq = wq_ref[0]                                 # (D, D) bf16 (Wq^T, shared by heads)
        wk = wk_ref[0]
        wv = wv_ref[0]
        wo = wo_ref[0]                                 # (E, E) bf16 (Wo^T)

        # Packed per-layer E-sized vectors: [bo, ln1_g, ln1_b, ln2_g, ln2_b, bf2]
        vec = vec_e_ref[0]                             # (6, E) f32
        bo, g1, b1, g2, b2, bf2 = (vec[i:i + 1, :] for i in range(6))
        bf1 = bf1_ref[0]                               # (1, Hid) f32

        # ---- multi-head attention (heads static, unrolled; true per-head weights) ----
        # fc_out(concat_h(head_h)) == sum_h head_h @ Wo^T[hD:(h+1)D, :] + bo,
        # accumulated as lane-dense (S, E) partials in vregs (no column stores).
        attn_out = bo
        for h in range(heads):
            lo = h * head_dim
            hi = lo + head_dim
            xs = x_b[:, lo:hi]                                        # (S, D)
            q = jnp.dot(xs, wq, preferred_element_type=jnp.float32)   # (S, D)
            k = jnp.dot(xs, wk, preferred_element_type=jnp.float32)
            v = jnp.dot(xs, wv, preferred_element_type=jnp.float32)
            # q @ k^T without materializing a transpose
            energy = lax.dot_general(q.astype(jnp.bfloat16), k.astype(jnp.bfloat16),
                                     (((1,), (1,)), ((), ())),
                                     preferred_element_type=jnp.float32)   # (S, S)
            e = (energy + bias) * scale
            e = e - jnp.max(e, axis=-1, keepdims=True)                # stable softmax
            p = jnp.exp(e)
            attn = p * pl.reciprocal(jnp.sum(p, axis=-1, keepdims=True), approx=True)
            head_out = jnp.dot(attn.astype(jnp.bfloat16), v.astype(jnp.bfloat16),
                               preferred_element_type=jnp.float32)    # (S, D)
            attn_out = attn_out + jnp.dot(head_out.astype(jnp.bfloat16),
                                          wo[lo:hi, :],
                                          preferred_element_type=jnp.float32)  # (S, E)

        def layer_norm(t, g, b):
            mu = jnp.mean(t, axis=-1, keepdims=True)
            var = jnp.mean((t - mu) ** 2, axis=-1, keepdims=True)
            return (t - mu) * lax.rsqrt(var + eps) * g + b

        # x = query + dropout(norm_1(attention))      (dropout == identity, eval mode)
        xr = x + layer_norm(attn_out, g1, b1)

        # feed-forward: Linear -> ReLU -> Linear   (pre-transposed bf16 weights)
        h1 = jnp.dot(xr.astype(jnp.bfloat16), wf1_ref[0],
                     preferred_element_type=jnp.float32) + bf1
        h1 = jnp.maximum(h1, 0.0)
        ff = jnp.dot(h1.astype(jnp.bfloat16), wf2_ref[0],
                     preferred_element_type=jnp.float32) + bf2

        # out = x + dropout(norm_2(forward)) -> becomes the next layer's input
        res_ref[...] = xr + layer_norm(ff, g2, b2)

        # Write HBM output only after the last layer of this batch row.
        @pl.when(layer == num_layers - 1)
        def _():
            out_ref[0] = res_ref[...]

    return kernel


# ----------------------------------------------------------------------------
# One-time wrapper-side weight prep (hoisted out of the forward path):
# transpose, stack across layers, cast matmul weights to bf16, pack small vectors.
# ----------------------------------------------------------------------------
def prep_encoder_params(layer_params, heads):
    del heads  # head split handled inside the kernel

    def stack(f, dtype=None):
        a = jnp.stack([f(p) for p in layer_params], axis=0)
        return a.astype(dtype) if dtype is not None else a

    return {
        'wq': stack(lambda p: p['wq'].T, jnp.bfloat16),    # (L, D, D)
        'wk': stack(lambda p: p['wk'].T, jnp.bfloat16),
        'wv': stack(lambda p: p['wv'].T, jnp.bfloat16),
        'wo': stack(lambda p: p['wo'].T, jnp.bfloat16),    # (L, E, E)
        'wf1': stack(lambda p: p['wf1'].T, jnp.bfloat16),  # (L, E, Hid)
        'wf2': stack(lambda p: p['wf2'].T, jnp.bfloat16),  # (L, Hid, E)
        'vec_e': stack(lambda p: jnp.stack([p['bo'][0], p['g1'][0], p['b1'][0],
                                            p['g2'][0], p['b2'][0], p['bf2'][0]],
                                           axis=0)),       # (L, 6, E) f32
        'bf1': stack(lambda p: p['bf1']),                  # (L, 1, Hid) f32
    }


def _vmem_limit_bytes(per_step_bytes):
    """Per-generation VMEM budget: double-buffered per-step working set + headroom,
    clamped to 80% of the reported VMEM capacity (64 MiB/TC on v7x, 128 MiB on v5e/v6e)."""
    cap = 128 * 1024 * 1024
    try:
        cap = int(getattr(pltpu.get_tpu_info(), "vmem_capacity_bytes", cap))
    except Exception:
        pass
    want = 4 * per_step_bytes + (8 << 20)
    return int(min(max(want, 32 << 20), (cap * 4) // 5))


def encoder_pallas(x, bias, ep, heads):
    """x: (N,S,E) f32 embeddings+pos, bias: (N,1,S) f32 additive mask bias,
    ep: prepped / layer-stacked params."""
    N, S, E = x.shape
    L, D, _ = ep['wq'].shape
    Hid = ep['wf1'].shape[-1]
    assert D * heads == E

    kernel = make_encoder_kernel(L, heads, D, E)

    def wspec(*shape):   # per-layer weight slab, indexed by the layer grid coordinate
        return pl.BlockSpec((1,) + shape, lambda b, l: (l, 0, 0))

    act_spec = pl.BlockSpec((1, S, E), lambda b, l: (b, 0, 0))   # constant across l
    bias_spec = pl.BlockSpec((1, 1, S), lambda b, l: (b, 0, 0))

    bytes_per_step = (2 * S * E * 4 + S * 4                          # x / out / bias (f32)
                      + 2 * (3 * D * D + E * E + 2 * E * Hid)        # bf16 weights
                      + (6 * E + Hid) * 4)                           # packed vectors (f32)

    return pl.pallas_call(
        kernel,
        out_shape=jax.ShapeDtypeStruct((N, S, E), jnp.float32),
        # Grid: (batch, layer).  Batch is "parallel" (>=2 points -> both v7x TCs busy);
        # layer is "arbitrary" (sequential dependency through res_ref scratch), and the
        # layer-indexed weight BlockSpecs give automatic next-layer weight prefetch.
        grid=(N, L),
        in_specs=[act_spec, bias_spec,
                  wspec(D, D), wspec(D, D), wspec(D, D),             # Wq^T/Wk^T/Wv^T
                  wspec(E, E),                                       # Wo^T
                  wspec(E, Hid), wspec(Hid, E),                      # Wf1^T / Wf2^T
                  wspec(6, E), wspec(1, Hid)],                       # packed vectors
        out_specs=pl.BlockSpec((1, S, E), lambda b, l: (b, 0, 0)),
        scratch_shapes=[pltpu.VMEM((S, E), jnp.float32)],            # resident residual stream
        compiler_params=pltpu.CompilerParams(
            dimension_semantics=("parallel", "arbitrary"),
            vmem_limit_bytes=_vmem_limit_bytes(bytes_per_step)),
    )(x, bias, ep['wq'], ep['wk'], ep['wv'], ep['wo'], ep['wf1'], ep['wf2'],
      ep['vec_e'], ep['bf1'])


# ----------------------------------------------------------------------------
# Glue: embedding lookup + sinusoidal positional encoding (matches the numpy
# implementation in PositionalEncoding.forward).
# ----------------------------------------------------------------------------
def positional_encoding(seq_len, embed_size):
    pos = np.arange(seq_len)[:, None].astype(np.float64)
    i = np.arange(embed_size)[None, :]
    angles = pos * (1.0 / np.power(10000.0, 2 * (i // 2) / np.float32(embed_size)))
    angles[:, 0::2] = np.sin(angles[:, 0::2])
    angles[:, 1::2] = np.cos(angles[:, 1::2])
    return jnp.asarray(angles, dtype=jnp.float32)[None]   # (1, S, E)


def encoder_forward(tokens, mask, embedding, ep, heads):
    emb = embedding[tokens]                          # (N, S, E) gather (glue)
    S, E = emb.shape[1], emb.shape[2]
    x = emb + positional_encoding(S, E)
    # Mask bias precomputed once in the wrapper (0 => masked key).
    bias = jnp.where(mask == 0.0, jnp.float32(-1e20), jnp.float32(0.0))   # (N, 1, S)
    return encoder_pallas(x, bias, ep, heads)


# ----------------------------------------------------------------------------
# Deterministic parameter initialization (synthetic, not a checkpoint load).
# ----------------------------------------------------------------------------
def init_params(key, vocab, embed_size, heads, forward_expansion, num_layers):
    D = embed_size // heads
    Hid = forward_expansion * embed_size
    keys = jax.random.split(key, 1 + num_layers)
    params = {'embedding': jax.random.normal(keys[0], (vocab, embed_size), jnp.float32) * 0.1,
              'layers': []}
    for l in range(num_layers):
        ks = jax.random.split(keys[1 + l], 8)
        s = 0.08
        lp = {
            'wq': jax.random.normal(ks[0], (D, D), jnp.float32) * s,
            'wk': jax.random.normal(ks[1], (D, D), jnp.float32) * s,
            'wv': jax.random.normal(ks[2], (D, D), jnp.float32) * s,
            'wo': jax.random.normal(ks[3], (embed_size, embed_size), jnp.float32) * s,
            'bo': jax.random.normal(ks[4], (1, embed_size), jnp.float32) * s,
            'g1': jnp.ones((1, embed_size), jnp.float32),
            'b1': jnp.zeros((1, embed_size), jnp.float32),
            'g2': jnp.ones((1, embed_size), jnp.float32),
            'b2': jnp.zeros((1, embed_size), jnp.float32),
            'wf1': jax.random.normal(ks[5], (Hid, embed_size), jnp.float32) * s,
            'bf1': jax.random.normal(ks[6], (1, Hid), jnp.float32) * s,
            'wf2': jax.random.normal(ks[7], (embed_size, Hid), jnp.float32) * s,
            'bf2': jnp.zeros((1, embed_size), jnp.float32),
        }
        params['layers'].append(lp)
    return params


# ----------------------------------------------------------------------------
# Pure-JAX reference mirroring the PyTorch forward, using the same precision
# policy as the kernel (bf16 matmul operands, f32 accumulation).
# ----------------------------------------------------------------------------
def ref_encoder(tokens, mask, params, heads):
    def bf(t):
        return t.astype(jnp.bfloat16)

    emb = params['embedding'][tokens]
    N, S, E = emb.shape
    D = E // heads
    x = emb + positional_encoding(S, E)
    for p in params['layers']:
        xh = x.reshape(N, S, heads, D)
        q = jnp.einsum('nshd,ed->nshe', bf(xh), bf(p['wq']),
                       preferred_element_type=jnp.float32)
        k = jnp.einsum('nshd,ed->nshe', bf(xh), bf(p['wk']),
                       preferred_element_type=jnp.float32)
        v = jnp.einsum('nshd,ed->nshe', bf(xh), bf(p['wv']),
                       preferred_element_type=jnp.float32)
        energy = jnp.einsum('nqhd,nkhd->nhqk', bf(q), bf(k),
                            preferred_element_type=jnp.float32)
        energy = jnp.where(mask[:, :, None, :] == 0.0, -1e20, energy)
        attn = jax.nn.softmax(energy / math.sqrt(E), axis=3)
        o = jnp.einsum('nhqk,nkhd->nqhd', bf(attn), bf(v),
                       preferred_element_type=jnp.float32).reshape(N, S, E)
        o = jnp.dot(bf(o), bf(p['wo']).T,
                    preferred_element_type=jnp.float32) + p['bo'][0]

        def ln(t, g, b):
            mu = t.mean(-1, keepdims=True)
            var = ((t - mu) ** 2).mean(-1, keepdims=True)
            return (t - mu) * lax.rsqrt(var + 1e-5) * g + b

        xr = x + ln(o, p['g1'][0], p['b1'][0])
        h1 = jnp.maximum(jnp.dot(bf(xr), bf(p['wf1']).T,
                                 preferred_element_type=jnp.float32) + p['bf1'][0], 0.0)
        ff = jnp.dot(bf(h1), bf(p['wf2']).T,
                     preferred_element_type=jnp.float32) + p['bf2'][0]
        x = xr + ln(ff, p['g2'][0], p['b2'][0])
    return x


if __name__ == "__main__":
    N, S = 2, 8
    VOCAB, E, HEADS, FWD_EXP, LAYERS = 50, 32, 4, 4, 2

    key = jax.random.PRNGKey(0)
    k_tok, k_par = jax.random.split(key)
    tokens = jax.random.randint(k_tok, (N, S), 0, VOCAB, dtype=jnp.int32)

    # key-padding mask, shape (N, 1, S): 1 = attend, 0 = masked.
    mask = jnp.ones((N, 1, S), jnp.float32).at[1, 0, S - 1].set(0.0)

    params = init_params(k_par, VOCAB, E, HEADS, FWD_EXP, LAYERS)

    # One-time weight prep, hoisted out of the forward path.
    ep = prep_encoder_params(params['layers'], HEADS)

    out = jax.block_until_ready(encoder_forward(tokens, mask, params['embedding'], ep, HEADS))
    ref = jax.block_until_ready(ref_encoder(tokens, mask, params, HEADS))

    # Tolerance covers approx-reciprocal softmax and MXU-vs-XLA reduction-order
    # differences (both kernel and reference use bf16 operands / f32 accumulation).
    np.testing.assert_allclose(np.asarray(out), np.asarray(ref), rtol=2e-2, atol=2e-2)

    # TODO(synk): dropout is treated as eval-mode (identity); training-mode RNG
    # dropout is not implemented in the kernel.
    print("KERNEL_OK")
</pallas_src>

<mosaic_0001>
module attributes {stable_mosaic.version = 11 : i64} {
  func.func @kernel(%arg0: i32, %arg1: i32, %arg2: memref<1x8x32xf32, #tpu.memory_space<vmem>>, %arg3: memref<1x1x8xf32, #tpu.memory_space<vmem>>, %arg4: memref<1x8x8xbf16, #tpu.memory_space<vmem>>, %arg5: memref<1x8x8xbf16, #tpu.memory_space<vmem>>, %arg6: memref<1x8x8xbf16, #tpu.memory_space<vmem>>, %arg7: memref<1x32x32xbf16, #tpu.memory_space<vmem>>, %arg8: memref<1x32x128xbf16, #tpu.memory_space<vmem>>, %arg9: memref<1x128x32xbf16, #tpu.memory_space<vmem>>, %arg10: memref<1x6x32xf32, #tpu.memory_space<vmem>>, %arg11: memref<1x1x128xf32, #tpu.memory_space<vmem>>, %arg12: memref<1x8x32xf32, #tpu.memory_space<vmem>>, %arg13: memref<8x32xf32, #tpu.memory_space<vmem>>) attributes {dimension_semantics = [#tpu.dimension_semantics<parallel>, #tpu.dimension_semantics<arbitrary>], iteration_bounds = array<i64: 2, 2>, scalar_prefetch = 0 : i64, scratch_operands = 1 : i64, tpu.core_type = #tpu.core_type<tc>, window_params = [{transform_indices = @transform_0, window_bounds = array<i64: 1, 8, 32>}, {transform_indices = @transform_1, window_bounds = array<i64: 1, 1, 8>}, {transform_indices = @transform_2, window_bounds = array<i64: 1, 8, 8>}, {transform_indices = @transform_3, window_bounds = array<i64: 1, 8, 8>}, {transform_indices = @transform_4, window_bounds = array<i64: 1, 8, 8>}, {transform_indices = @transform_5, window_bounds = array<i64: 1, 32, 32>}, {transform_indices = @transform_6, window_bounds = array<i64: 1, 32, 128>}, {transform_indices = @transform_7, window_bounds = array<i64: 1, 128, 32>}, {transform_indices = @transform_8, window_bounds = array<i64: 1, 6, 32>}, {transform_indices = @transform_9, window_bounds = array<i64: 1, 1, 128>}, {transform_indices = @transform_10, window_bounds = array<i64: 1, 8, 32>}]} {
    %c0_i32 = arith.constant 0 : i32
    %0 = arith.cmpi eq, %arg1, %c0_i32 : i32
    %1 = arith.extui %0 : i1 to i32
    %c0_i32_0 = arith.constant 0 : i32
    %2 = arith.cmpi ne, %1, %c0_i32_0 : i32
    scf.if %2 {
      %c0_80 = arith.constant 0 : index
      %c0_81 = arith.constant 0 : index
      %c0_82 = arith.constant 0 : index
      %202 = vector.load %arg2[%c0_80, %c0_81, %c0_82] : memref<1x8x32xf32, #tpu.memory_space<vmem>>, vector<1x8x32xf32>
      %203 = vector.shape_cast %202 : vector<1x8x32xf32> to vector<8x32xf32>
      %c0_83 = arith.constant 0 : index
      %c0_84 = arith.constant 0 : index
      %204 = vector.load %arg13[%c0_83, %c0_84] : memref<8x32xf32, #tpu.memory_space<vmem>>, vector<8x32xf32>
      tpu.vector_store %arg13[%c0_83, %c0_84], %203 {strides = array<i32>} : memref<8x32xf32, #tpu.memory_space<vmem>>, vector<8x32xf32>,
    } else {
    }
    %c0 = arith.constant 0 : index
    %c0_1 = arith.constant 0 : index
    %3 = vector.load %arg13[%c0, %c0_1] : memref<8x32xf32, #tpu.memory_space<vmem>>, vector<8x32xf32>
    %c0_2 = arith.constant 0 : index
    %c0_3 = arith.constant 0 : index
    %c0_4 = arith.constant 0 : index
    %4 = vector.load %arg3[%c0_2, %c0_3, %c0_4] : memref<1x1x8xf32, #tpu.memory_space<vmem>>, vector<1x1x8xf32>
    %5 = vector.shape_cast %4 : vector<1x1x8xf32> to vector<1x8xf32>
    %6 = arith.truncf %3 : vector<8x32xf32> to vector<8x32xbf16>
    %c0_5 = arith.constant 0 : index
    %c0_6 = arith.constant 0 : index
    %c0_7 = arith.constant 0 : index
    %7 = vector.load %arg4[%c0_5, %c0_6, %c0_7] : memref<1x8x8xbf16, #tpu.memory_space<vmem>>, vector<1x8x8xbf16>
    %8 = vector.shape_cast %7 : vector<1x8x8xbf16> to vector<8x8xbf16>
    %c0_8 = arith.constant 0 : index
    %c0_9 = arith.constant 0 : index
    %c0_10 = arith.constant 0 : index
    %9 = vector.load %arg5[%c0_8, %c0_9, %c0_10] : memref<1x8x8xbf16, #tpu.memory_space<vmem>>, vector<1x8x8xbf16>
    %10 = vector.shape_cast %9 : vector<1x8x8xbf16> to vector<8x8xbf16>
    %c0_11 = arith.constant 0 : index
    %c0_12 = arith.constant 0 : index
    %c0_13 = arith.constant 0 : index
    %11 = vector.load %arg6[%c0_11, %c0_12, %c0_13] : memref<1x8x8xbf16, #tpu.memory_space<vmem>>, vector<1x8x8xbf16>
    %12 = vector.shape_cast %11 : vector<1x8x8xbf16> to vector<8x8xbf16>
    %c0_14 = arith.constant 0 : index
    %c0_15 = arith.constant 0 : index
    %c0_16 = arith.constant 0 : index
    %13 = vector.load %arg7[%c0_14, %c0_15, %c0_16] : memref<1x32x32xbf16, #tpu.memory_space<vmem>>, vector<1x32x32xbf16>
    %14 = vector.shape_cast %13 : vector<1x32x32xbf16> to vector<32x32xbf16>
    %c0_17 = arith.constant 0 : index
    %c0_18 = arith.constant 0 : index
    %c0_19 = arith.constant 0 : index
    %15 = vector.load %arg10[%c0_17, %c0_18, %c0_19] : memref<1x6x32xf32, #tpu.memory_space<vmem>>, vector<1x6x32xf32>
    %16 = vector.shape_cast %15 : vector<1x6x32xf32> to vector<6x32xf32>
    %17 = vector.extract_strided_slice %16 {offsets = [0, 0], sizes = [1, 32], strides = [1, 1]} : vector<6x32xf32> to vector<1x32xf32>
    %18 = vector.extract_strided_slice %16 {offsets = [1, 0], sizes = [1, 32], strides = [1, 1]} : vector<6x32xf32> to vector<1x32xf32>
    %19 = vector.extract_strided_slice %16 {offsets = [2, 0], sizes = [1, 32], strides = [1, 1]} : vector<6x32xf32> to vector<1x32xf32>
    %20 = vector.extract_strided_slice %16 {offsets = [3, 0], sizes = [1, 32], strides = [1, 1]} : vector<6x32xf32> to vector<1x32xf32>
    %21 = vector.extract_strided_slice %16 {offsets = [4, 0], sizes = [1, 32], strides = [1, 1]} : vector<6x32xf32> to vector<1x32xf32>
    %22 = vector.extract_strided_slice %16 {offsets = [5, 0], sizes = [1, 32], strides = [1, 1]} : vector<6x32xf32> to vector<1x32xf32>
    %c0_20 = arith.constant 0 : index
    %c0_21 = arith.constant 0 : index
    %c0_22 = arith.constant 0 : index
    %23 = vector.load %arg11[%c0_20, %c0_21, %c0_22] : memref<1x1x128xf32, #tpu.memory_space<vmem>>, vector<1x1x128xf32>
    %24 = vector.shape_cast %23 : vector<1x1x128xf32> to vector<1x128xf32>
    %25 = vector.extract_strided_slice %6 {offsets = [0, 0], sizes = [8, 8], strides = [1, 1]} : vector<8x32xbf16> to vector<8x8xbf16>
    %cst = arith.constant dense<0.000000e+00> : vector<8x8xf32>
    %26 = tpu.matmul %25, %8, %cst {dimension_numbers = #tpu.dot_dimension_numbers<[1], [0], [0], [1], [0, 0, 1, 1], [], []>} : vector<8x8xbf16>, vector<8x8xbf16>, vector<8x8xf32> -> vector<8x8xf32>
    %cst_23 = arith.constant dense<0.000000e+00> : vector<8x8xf32>
    %27 = tpu.matmul %25, %10, %cst_23 {dimension_numbers = #tpu.dot_dimension_numbers<[1], [0], [0], [1], [0, 0, 1, 1], [], []>} : vector<8x8xbf16>, vector<8x8xbf16>, vector<8x8xf32> -> vector<8x8xf32>
    %cst_24 = arith.constant dense<0.000000e+00> : vector<8x8xf32>
    %28 = tpu.matmul %25, %12, %cst_24 {dimension_numbers = #tpu.dot_dimension_numbers<[1], [0], [0], [1], [0, 0, 1, 1], [], []>} : vector<8x8xbf16>, vector<8x8xbf16>, vector<8x8xf32> -> vector<8x8xf32>
    %29 = arith.truncf %26 : vector<8x8xf32> to vector<8x8xbf16>
    %30 = arith.truncf %27 : vector<8x8xf32> to vector<8x8xbf16>
    %cst_25 = arith.constant dense<0.000000e+00> : vector<8x8xf32>
    %31 = tpu.matmul %29, %30, %cst_25 {dimension_numbers = #tpu.dot_dimension_numbers<[1], [1], [0], [0], [0, 0, 1, 0], [], []>} : vector<8x8xbf16>, vector<8x8xbf16>, vector<8x8xf32> -> vector<8x8xf32>
    %32 = vector.broadcast %5 : vector<1x8xf32> to vector<8x8xf32>
    %33 = arith.addf %31, %32 : vector<8x8xf32>
    %cst_26 = arith.constant 0.176776692 : f32
    %34 = vector.broadcast %cst_26 : f32 to vector<8x8xf32>
    %35 = arith.mulf %33, %34 : vector<8x8xf32>
    %cst_27 = arith.constant dense<0xFF800000> : vector<8xf32>
    %36 = vector.multi_reduction <maximumf>, %35, %cst_27 [1] : vector<8x8xf32> to vector<8xf32>
    %37 = vector.shape_cast %36 : vector<8xf32> to vector<8x1xf32>
    %38 = vector.broadcast %37 : vector<8x1xf32> to vector<8x8xf32>
    %39 = arith.subf %35, %38 : vector<8x8xf32>
    %40 = math.exp %39 : vector<8x8xf32>
    %cst_28 = arith.constant dense<0.000000e+00> : vector<8xf32>
    %41 = vector.multi_reduction <add>, %40, %cst_28 [1] : vector<8x8xf32> to vector<8xf32>
    %42 = vector.shape_cast %41 : vector<8xf32> to vector<8x1xf32>
    %43 = tpu.reciprocal %42 {approx = true} : vector<8x1xf32> -> vector<8x1xf32>
    %44 = vector.broadcast %43 : vector<8x1xf32> to vector<8x8xf32>
    %45 = arith.mulf %40, %44 : vector<8x8xf32>
    %46 = arith.truncf %45 : vector<8x8xf32> to vector<8x8xbf16>
    %47 = arith.truncf %28 : vector<8x8xf32> to vector<8x8xbf16>
    %cst_29 = arith.constant dense<0.000000e+00> : vector<8x8xf32>
    %48 = tpu.matmul %46, %47, %cst_29 {dimension_numbers = #tpu.dot_dimension_numbers<[1], [0], [0], [1], [0, 0, 1, 1], [], []>} : vector<8x8xbf16>, vector<8x8xbf16>, vector<8x8xf32> -> vector<8x8xf32>
    %49 = arith.truncf %48 : vector<8x8xf32> to vector<8x8xbf16>
    %50 = vector.extract_strided_slice %14 {offsets = [0, 0], sizes = [8, 32], strides = [1, 1]} : vector<32x32xbf16> to vector<8x32xbf16>
    %cst_30 = arith.constant dense<0.000000e+00> : vector<8x32xf32>
    %51 = tpu.matmul %49, %50, %cst_30 {dimension_numbers = #tpu.dot_dimension_numbers<[1], [0], [0], [1], [0, 0, 1, 1], [], []>} : vector<8x8xbf16>, vector<8x32xbf16>, vector<8x32xf32> -> vector<8x32xf32>
    %52 = vector.broadcast %17 : vector<1x32xf32> to vector<8x32xf32>
    %53 = arith.addf %52, %51 : vector<8x32xf32>
    %54 = vector.extract_strided_slice %6 {offsets = [0, 8], sizes = [8, 8], strides = [1, 1]} : vector<8x32xbf16> to vector<8x8xbf16>
    %cst_31 = arith.constant dense<0.000000e+00> : vector<8x8xf32>
    %55 = tpu.matmul %54, %8, %cst_31 {dimension_numbers = #tpu.dot_dimension_numbers<[1], [0], [0], [1], [0, 0, 1, 1], [], []>} : vector<8x8xbf16>, vector<8x8xbf16>, vector<8x8xf32> -> vector<8x8xf32>
    %cst_32 = arith.constant dense<0.000000e+00> : vector<8x8xf32>
    %56 = tpu.matmul %54, %10, %cst_32 {dimension_numbers = #tpu.dot_dimension_numbers<[1], [0], [0], [1], [0, 0, 1, 1], [], []>} : vector<8x8xbf16>, vector<8x8xbf16>, vector<8x8xf32> -> vector<8x8xf32>
    %cst_33 = arith.constant dense<0.000000e+00> : vector<8x8xf32>
    %57 = tpu.matmul %54, %12, %cst_33 {dimension_numbers = #tpu.dot_dimension_numbers<[1], [0], [0], [1], [0, 0, 1, 1], [], []>} : vector<8x8xbf16>, vector<8x8xbf16>, vector<8x8xf32> -> vector<8x8xf32>
    %58 = arith.truncf %55 : vector<8x8xf32> to vector<8x8xbf16>
    %59 = arith.truncf %56 : vector<8x8xf32> to vector<8x8xbf16>
    %cst_34 = arith.constant dense<0.000000e+00> : vector<8x8xf32>
    %60 = tpu.matmul %58, %59, %cst_34 {dimension_numbers = #tpu.dot_dimension_numbers<[1], [1], [0], [0], [0, 0, 1, 0], [], []>} : vector<8x8xbf16>, vector<8x8xbf16>, vector<8x8xf32> -> vector<8x8xf32>
    %61 = vector.broadcast %5 : vector<1x8xf32> to vector<8x8xf32>
    %62 = arith.addf %60, %61 : vector<8x8xf32>
    %cst_35 = arith.constant 0.176776692 : f32
    %63 = vector.broadcast %cst_35 : f32 to vector<8x8xf32>
    %64 = arith.mulf %62, %63 : vector<8x8xf32>
    %cst_36 = arith.constant dense<0xFF800000> : vector<8xf32>
    %65 = vector.multi_reduction <maximumf>, %64, %cst_36 [1] : vector<8x8xf32> to vector<8xf32>
    %66 = vector.shape_cast %65 : vector<8xf32> to vector<8x1xf32>
    %67 = vector.broadcast %66 : vector<8x1xf32> to vector<8x8xf32>
    %68 = arith.subf %64, %67 : vector<8x8xf32>
    %69 = math.exp %68 : vector<8x8xf32>
    %cst_37 = arith.constant dense<0.000000e+00> : vector<8xf32>
    %70 = vector.multi_reduction <add>, %69, %cst_37 [1] : vector<8x8xf32> to vector<8xf32>
    %71 = vector.shape_cast %70 : vector<8xf32> to vector<8x1xf32>
    %72 = tpu.reciprocal %71 {approx = true} : vector<8x1xf32> -> vector<8x1xf32>
    %73 = vector.broadcast %72 : vector<8x1xf32> to vector<8x8xf32>
    %74 = arith.mulf %69, %73 : vector<8x8xf32>
    %75 = arith.truncf %74 : vector<8x8xf32> to vector<8x8xbf16>
    %76 = arith.truncf %57 : vector<8x8xf32> to vector<8x8xbf16>
    %cst_38 = arith.constant dense<0.000000e+00> : vector<8x8xf32>
    %77 = tpu.matmul %75, %76, %cst_38 {dimension_numbers = #tpu.dot_dimension_numbers<[1], [0], [0], [1], [0, 0, 1, 1], [], []>} : vector<8x8xbf16>, vector<8x8xbf16>, vector<8x8xf32> -> vector<8x8xf32>
    %78 = arith.truncf %77 : vector<8x8xf32> to vector<8x8xbf16>
    %79 = vector.extract_strided_slice %14 {offsets = [8, 0], sizes = [8, 32], strides = [1, 1]} : vector<32x32xbf16> to vector<8x32xbf16>
    %cst_39 = arith.constant dense<0.000000e+00> : vector<8x32xf32>
    %80 = tpu.matmul %78, %79, %cst_39 {dimension_numbers = #tpu.dot_dimension_numbers<[1], [0], [0], [1], [0, 0, 1, 1], [], []>} : vector<8x8xbf16>, vector<8x32xbf16>, vector<8x32xf32> -> vector<8x32xf32>
    %81 = arith.addf %53, %80 : vector<8x32xf32>
    %82 = vector.extract_strided_slice %6 {offsets = [0, 16], sizes = [8, 8], strides = [1, 1]} : vector<8x32xbf16> to vector<8x8xbf16>
    %cst_40 = arith.constant dense<0.000000e+00> : vector<8x8xf32>
    %83 = tpu.matmul %82, %8, %cst_40 {dimension_numbers = #tpu.dot_dimension_numbers<[1], [0], [0], [1], [0, 0, 1, 1], [], []>} : vector<8x8xbf16>, vector<8x8xbf16>, vector<8x8xf32> -> vector<8x8xf32>
    %cst_41 = arith.constant dense<0.000000e+00> : vector<8x8xf32>
    %84 = tpu.matmul %82, %10, %cst_41 {dimension_numbers = #tpu.dot_dimension_numbers<[1], [0], [0], [1], [0, 0, 1, 1], [], []>} : vector<8x8xbf16>, vector<8x8xbf16>, vector<8x8xf32> -> vector<8x8xf32>
    %cst_42 = arith.constant dense<0.000000e+00> : vector<8x8xf32>
    %85 = tpu.matmul %82, %12, %cst_42 {dimension_numbers = #tpu.dot_dimension_numbers<[1], [0], [0], [1], [0, 0, 1, 1], [], []>} : vector<8x8xbf16>, vector<8x8xbf16>, vector<8x8xf32> -> vector<8x8xf32>
    %86 = arith.truncf %83 : vector<8x8xf32> to vector<8x8xbf16>
    %87 = arith.truncf %84 : vector<8x8xf32> to vector<8x8xbf16>
    %cst_43 = arith.constant dense<0.000000e+00> : vector<8x8xf32>
    %88 = tpu.matmul %86, %87, %cst_43 {dimension_numbers = #tpu.dot_dimension_numbers<[1], [1], [0], [0], [0, 0, 1, 0], [], []>} : vector<8x8xbf16>, vector<8x8xbf16>, vector<8x8xf32> -> vector<8x8xf32>
    %89 = vector.broadcast %5 : vector<1x8xf32> to vector<8x8xf32>
    %90 = arith.addf %88, %89 : vector<8x8xf32>
    %cst_44 = arith.constant 0.176776692 : f32
    %91 = vector.broadcast %cst_44 : f32 to vector<8x8xf32>
    %92 = arith.mulf %90, %91 : vector<8x8xf32>
    %cst_45 = arith.constant dense<0xFF800000> : vector<8xf32>
    %93 = vector.multi_reduction <maximumf>, %92, %cst_45 [1] : vector<8x8xf32> to vector<8xf32>
    %94 = vector.shape_cast %93 : vector<8xf32> to vector<8x1xf32>
    %95 = vector.broadcast %94 : vector<8x1xf32> to vector<8x8xf32>
    %96 = arith.subf %92, %95 : vector<8x8xf32>
    %97 = math.exp %96 : vector<8x8xf32>
    %cst_46 = arith.constant dense<0.000000e+00> : vector<8xf32>
    %98 = vector.multi_reduction <add>, %97, %cst_46 [1] : vector<8x8xf32> to vector<8xf32>
    %99 = vector.shape_cast %98 : vector<8xf32> to vector<8x1xf32>
    %100 = tpu.reciprocal %99 {approx = true} : vector<8x1xf32> -> vector<8x1xf32>
    %101 = vector.broadcast %100 : vector<8x1xf32> to vector<8x8xf32>
    %102 = arith.mulf %97, %101 : vector<8x8xf32>
    %103 = arith.truncf %102 : vector<8x8xf32> to vector<8x8xbf16>
    %104 = arith.truncf %85 : vector<8x8xf32> to vector<8x8xbf16>
    %cst_47 = arith.constant dense<0.000000e+00> : vector<8x8xf32>
    %105 = tpu.matmul %103, %104, %cst_47 {dimension_numbers = #tpu.dot_dimension_numbers<[1], [0], [0], [1], [0, 0, 1, 1], [], []>} : vector<8x8xbf16>, vector<8x8xbf16>, vector<8x8xf32> -> vector<8x8xf32>
    %106 = arith.truncf %105 : vector<8x8xf32> to vector<8x8xbf16>
    %107 = vector.extract_strided_slice %14 {offsets = [16, 0], sizes = [8, 32], strides = [1, 1]} : vector<32x32xbf16> to vector<8x32xbf16>
    %cst_48 = arith.constant dense<0.000000e+00> : vector<8x32xf32>
    %108 = tpu.matmul %106, %107, %cst_48 {dimension_numbers = #tpu.dot_dimension_numbers<[1], [0], [0], [1], [0, 0, 1, 1], [], []>} : vector<8x8xbf16>, vector<8x32xbf16>, vector<8x32xf32> -> vector<8x32xf32>
    %109 = arith.addf %81, %108 : vector<8x32xf32>
    %110 = vector.extract_strided_slice %6 {offsets = [0, 24], sizes = [8, 8], strides = [1, 1]} : vector<8x32xbf16> to vector<8x8xbf16>
    %cst_49 = arith.constant dense<0.000000e+00> : vector<8x8xf32>
    %111 = tpu.matmul %110, %8, %cst_49 {dimension_numbers = #tpu.dot_dimension_numbers<[1], [0], [0], [1], [0, 0, 1, 1], [], []>} : vector<8x8xbf16>, vector<8x8xbf16>, vector<8x8xf32> -> vector<8x8xf32>
    %cst_50 = arith.constant dense<0.000000e+00> : vector<8x8xf32>
    %112 = tpu.matmul %110, %10, %cst_50 {dimension_numbers = #tpu.dot_dimension_numbers<[1], [0], [0], [1], [0, 0, 1, 1], [], []>} : vector<8x8xbf16>, vector<8x8xbf16>, vector<8x8xf32> -> vector<8x8xf32>
    %cst_51 = arith.constant dense<0.000000e+00> : vector<8x8xf32>
    %113 = tpu.matmul %110, %12, %cst_51 {dimension_numbers = #tpu.dot_dimension_numbers<[1], [0], [0], [1], [0, 0, 1, 1], [], []>} : vector<8x8xbf16>, vector<8x8xbf16>, vector<8x8xf32> -> vector<8x8xf32>
    %114 = arith.truncf %111 : vector<8x8xf32> to vector<8x8xbf16>
    %115 = arith.truncf %112 : vector<8x8xf32> to vector<8x8xbf16>
    %cst_52 = arith.constant dense<0.000000e+00> : vector<8x8xf32>
    %116 = tpu.matmul %114, %115, %cst_52 {dimension_numbers = #tpu.dot_dimension_numbers<[1], [1], [0], [0], [0, 0, 1, 0], [], []>} : vector<8x8xbf16>, vector<8x8xbf16>, vector<8x8xf32> -> vector<8x8xf32>
    %117 = vector.broadcast %5 : vector<1x8xf32> to vector<8x8xf32>
    %118 = arith.addf %116, %117 : vector<8x8xf32>
    %cst_53 = arith.constant 0.176776692 : f32
    %119 = vector.broadcast %cst_53 : f32 to vector<8x8xf32>
    %120 = arith.mulf %118, %119 : vector<8x8xf32>
    %cst_54 = arith.constant dense<0xFF800000> : vector<8xf32>
    %121 = vector.multi_reduction <maximumf>, %120, %cst_54 [1] : vector<8x8xf32> to vector<8xf32>
    %122 = vector.shape_cast %121 : vector<8xf32> to vector<8x1xf32>
    %123 = vector.broadcast %122 : vector<8x1xf32> to vector<8x8xf32>
    %124 = arith.subf %120, %123 : vector<8x8xf32>
    %125 = math.exp %124 : vector<8x8xf32>
    %cst_55 = arith.constant dense<0.000000e+00> : vector<8xf32>
    %126 = vector.multi_reduction <add>, %125, %cst_55 [1] : vector<8x8xf32> to vector<8xf32>
    %127 = vector.shape_cast %126 : vector<8xf32> to vector<8x1xf32>
    %128 = tpu.reciprocal %127 {approx = true} : vector<8x1xf32> -> vector<8x1xf32>
    %129 = vector.broadcast %128 : vector<8x1xf32> to vector<8x8xf32>
    %130 = arith.mulf %125, %129 : vector<8x8xf32>
    %131 = arith.truncf %130 : vector<8x8xf32> to vector<8x8xbf16>
    %132 = arith.truncf %113 : vector<8x8xf32> to vector<8x8xbf16>
    %cst_56 = arith.constant dense<0.000000e+00> : vector<8x8xf32>
    %133 = tpu.matmul %131, %132, %cst_56 {dimension_numbers = #tpu.dot_dimension_numbers<[1], [0], [0], [1], [0, 0, 1, 1], [], []>} : vector<8x8xbf16>, vector<8x8xbf16>, vector<8x8xf32> -> vector<8x8xf32>
    %134 = arith.truncf %133 : vector<8x8xf32> to vector<8x8xbf16>
    %135 = vector.extract_strided_slice %14 {offsets = [24, 0], sizes = [8, 32], strides = [1, 1]} : vector<32x32xbf16> to vector<8x32xbf16>
    %cst_57 = arith.constant dense<0.000000e+00> : vector<8x32xf32>
    %136 = tpu.matmul %134, %135, %cst_57 {dimension_numbers = #tpu.dot_dimension_numbers<[1], [0], [0], [1], [0, 0, 1, 1], [], []>} : vector<8x8xbf16>, vector<8x32xbf16>, vector<8x32xf32> -> vector<8x32xf32>
    %137 = arith.addf %109, %136 : vector<8x32xf32>
    %cst_58 = arith.constant dense<0.000000e+00> : vector<8xf32>
    %138 = vector.multi_reduction <add>, %137, %cst_58 [1] : vector<8x32xf32> to vector<8xf32>
    %139 = vector.shape_cast %138 : vector<8xf32> to vector<8x1xf32>
    %cst_59 = arith.constant 3.200000e+01 : f32
    %140 = vector.broadcast %cst_59 : f32 to vector<8x1xf32>
    %141 = arith.divf %139, %140 : vector<8x1xf32>
    %142 = vector.broadcast %141 : vector<8x1xf32> to vector<8x32xf32>
    %143 = arith.subf %137, %142 : vector<8x32xf32>
    %144 = arith.mulf %143, %143 : vector<8x32xf32>
    %cst_60 = arith.constant dense<0.000000e+00> : vector<8xf32>
    %145 = vector.multi_reduction <add>, %144, %cst_60 [1] : vector<8x32xf32> to vector<8xf32>
    %146 = vector.shape_cast %145 : vector<8xf32> to vector<8x1xf32>
    %cst_61 = arith.constant 3.200000e+01 : f32
    %147 = vector.broadcast %cst_61 : f32 to vector<8x1xf32>
    %148 = arith.divf %146, %147 : vector<8x1xf32>
    %149 = vector.broadcast %141 : vector<8x1xf32> to vector<8x32xf32>
    %150 = arith.subf %137, %149 : vector<8x32xf32>
    %cst_62 = arith.constant 9.99999974E-6 : f32
    %151 = vector.broadcast %cst_62 : f32 to vector<8x1xf32>
    %152 = arith.addf %148, %151 : vector<8x1xf32>
    %153 = math.rsqrt %152 : vector<8x1xf32>
    %154 = vector.broadcast %153 : vector<8x1xf32> to vector<8x32xf32>
    %155 = arith.mulf %150, %154 : vector<8x32xf32>
    %156 = vector.broadcast %18 : vector<1x32xf32> to vector<8x32xf32>
    %157 = arith.mulf %155, %156 : vector<8x32xf32>
    %158 = vector.broadcast %19 : vector<1x32xf32> to vector<8x32xf32>
    %159 = arith.addf %157, %158 : vector<8x32xf32>
    %160 = arith.addf %3, %159 : vector<8x32xf32>
    %161 = arith.truncf %160 : vector<8x32xf32> to vector<8x32xbf16>
    %c0_63 = arith.constant 0 : index
    %c0_64 = arith.constant 0 : index
    %c0_65 = arith.constant 0 : index
    %162 = vector.load %arg8[%c0_63, %c0_64, %c0_65] : memref<1x32x128xbf16, #tpu.memory_space<vmem>>, vector<1x32x128xbf16>
    %163 = vector.shape_cast %162 : vector<1x32x128xbf16> to vector<32x128xbf16>
    %cst_66 = arith.constant dense<0.000000e+00> : vector<8x128xf32>
    %164 = tpu.matmul %161, %163, %cst_66 {dimension_numbers = #tpu.dot_dimension_numbers<[1], [0], [0], [1], [0, 0, 1, 1], [], []>} : vector<8x32xbf16>, vector<32x128xbf16>, vector<8x128xf32> -> vector<8x128xf32>
    %165 = vector.broadcast %24 : vector<1x128xf32> to vector<8x128xf32>
    %166 = arith.addf %164, %165 : vector<8x128xf32>
    %cst_67 = arith.constant 0.000000e+00 : f32
    %167 = vector.broadcast %cst_67 : f32 to vector<8x128xf32>
    %168 = arith.maximumf %166, %167 : vector<8x128xf32>
    %169 = arith.truncf %168 : vector<8x128xf32> to vector<8x128xbf16>
    %c0_68 = arith.constant 0 : index
    %c0_69 = arith.constant 0 : index
    %c0_70 = arith.constant 0 : index
    %170 = vector.load %arg9[%c0_68, %c0_69, %c0_70] : memref<1x128x32xbf16, #tpu.memory_space<vmem>>, vector<1x128x32xbf16>
    %171 = vector.shape_cast %170 : vector<1x128x32xbf16> to vector<128x32xbf16>
    %cst_71 = arith.constant dense<0.000000e+00> : vector<8x32xf32>
    %172 = tpu.matmul %169, %171, %cst_71 {dimension_numbers = #tpu.dot_dimension_numbers<[1], [0], [0], [1], [0, 0, 1, 1], [], []>} : vector<8x128xbf16>, vector<128x32xbf16>, vector<8x32xf32> -> vector<8x32xf32>
    %173 = vector.broadcast %22 : vector<1x32xf32> to vector<8x32xf32>
    %174 = arith.addf %172, %173 : vector<8x32xf32>
    %cst_72 = arith.constant dense<0.000000e+00> : vector<8xf32>
    %175 = vector.multi_reduction <add>, %174, %cst_72 [1] : vector<8x32xf32> to vector<8xf32>
    %176 = vector.shape_cast %175 : vector<8xf32> to vector<8x1xf32>
    %cst_73 = arith.constant 3.200000e+01 : f32
    %177 = vector.broadcast %cst_73 : f32 to vector<8x1xf32>
    %178 = arith.divf %176, %177 : vector<8x1xf32>
    %179 = vector.broadcast %178 : vector<8x1xf32> to vector<8x32xf32>
    %180 = arith.subf %174, %179 : vector<8x32xf32>
    %181 = arith.mulf %180, %180 : vector<8x32xf32>
    %cst_74 = arith.constant dense<0.000000e+00> : vector<8xf32>
    %182 = vector.multi_reduction <add>, %181, %cst_74 [1] : vector<8x32xf32> to vector<8xf32>
    %183 = vector.shape_cast %182 : vector<8xf32> to vector<8x1xf32>
    %cst_75 = arith.constant 3.200000e+01 : f32
    %184 = vector.broadcast %cst_75 : f32 to vector<8x1xf32>
    %185 = arith.divf %183, %184 : vector<8x1xf32>
    %186 = vector.broadcast %178 : vector<8x1xf32> to vector<8x32xf32>
    %187 = arith.subf %174, %186 : vector<8x32xf32>
    %cst_76 = arith.constant 9.99999974E-6 : f32
    %188 = vector.broadcast %cst_76 : f32 to vector<8x1xf32>
    %189 = arith.addf %185, %188 : vector<8x1xf32>
    %190 = math.rsqrt %189 : vector<8x1xf32>
    %191 = vector.broadcast %190 : vector<8x1xf32> to vector<8x32xf32>
    %192 = arith.mulf %187, %191 : vector<8x32xf32>
    %193 = vector.broadcast %20 : vector<1x32xf32> to vector<8x32xf32>
    %194 = arith.mulf %192, %193 : vector<8x32xf32>
    %195 = vector.broadcast %21 : vector<1x32xf32> to vector<8x32xf32>
    %196 = arith.addf %194, %195 : vector<8x32xf32>
    %197 = arith.addf %160, %196 : vector<8x32xf32>
    %c0_77 = arith.constant 0 : index
    %c0_78 = arith.constant 0 : index
    %198 = vector.load %arg13[%c0_77, %c0_78] : memref<8x32xf32, #tpu.memory_space<vmem>>, vector<8x32xf32>
    tpu.vector_store %arg13[%c0_77, %c0_78], %197 {strides = array<i32>} : memref<8x32xf32, #tpu.memory_space<vmem>>, vector<8x32xf32>,
    %c1_i32 = arith.constant 1 : i32
    %199 = arith.cmpi eq, %arg1, %c1_i32 : i32
    %200 = arith.extui %199 : i1 to i32
    %c0_i32_79 = arith.constant 0 : i32
    %201 = arith.cmpi ne, %200, %c0_i32_79 : i32
    scf.if %201 {
      %c0_80 = arith.constant 0 : index
      %c0_81 = arith.constant 0 : index
      %202 = vector.load %arg13[%c0_80, %c0_81] : memref<8x32xf32, #tpu.memory_space<vmem>>, vector<8x32xf32>
      %c0_82 = arith.constant 0 : index
      %c0_83 = arith.constant 0 : index
      %c0_84 = arith.constant 0 : index
      %203 = vector.load %arg12[%c0_82, %c0_83, %c0_84] : memref<1x8x32xf32, #tpu.memory_space<vmem>>, vector<1x8x32xf32>
      %204 = vector.shape_cast %203 : vector<1x8x32xf32> to vector<8x32xf32>
      %205 = vector.shape_cast %202 : vector<8x32xf32> to vector<1x8x32xf32>
      tpu.vector_store %arg12[%c0_82, %c0_83, %c0_84], %205 {strides = array<i32>} : memref<1x8x32xf32, #tpu.memory_space<vmem>>, vector<1x8x32xf32>,
    } else {
    }
    return
  }
  func.func @transform_0(%arg0: i32, %arg1: i32) -> (i32, i32, i32) {
    %c0_i32 = arith.constant 0 : i32
    %c0_i32_0 = arith.constant 0 : i32
    %c0_i32_1 = arith.constant 0 : i32
    return %arg0, %c0_i32, %c0_i32_0 : i32, i32, i32
  }
  func.func @transform_1(%arg0: i32, %arg1: i32) -> (i32, i32, i32) {
    %c0_i32 = arith.constant 0 : i32
    %c0_i32_0 = arith.constant 0 : i32
    %c0_i32_1 = arith.constant 0 : i32
    return %arg0, %c0_i32, %c0_i32_0 : i32, i32, i32
  }
  func.func @transform_2(%arg0: i32, %arg1: i32) -> (i32, i32, i32) {
    %c0_i32 = arith.constant 0 : i32
    %c0_i32_0 = arith.constant 0 : i32
    %c0_i32_1 = arith.constant 0 : i32
    return %arg1, %c0_i32, %c0_i32_0 : i32, i32, i32
  }
  func.func @transform_3(%arg0: i32, %arg1: i32) -> (i32, i32, i32) {
    %c0_i32 = arith.constant 0 : i32
    %c0_i32_0 = arith.constant 0 : i32
    %c0_i32_1 = arith.constant 0 : i32
    return %arg1, %c0_i32, %c0_i32_0 : i32, i32, i32
  }
  func.func @transform_4(%arg0: i32, %arg1: i32) -> (i32, i32, i32) {
    %c0_i32 = arith.constant 0 : i32
    %c0_i32_0 = arith.constant 0 : i32
    %c0_i32_1 = arith.constant 0 : i32
    return %arg1, %c0_i32, %c0_i32_0 : i32, i32, i32
  }
  func.func @transform_5(%arg0: i32, %arg1: i32) -> (i32, i32, i32) {
    %c0_i32 = arith.constant 0 : i32
    %c0_i32_0 = arith.constant 0 : i32
    %c0_i32_1 = arith.constant 0 : i32
    return %arg1, %c0_i32, %c0_i32_0 : i32, i32, i32
  }
  func.func @transform_6(%arg0: i32, %arg1: i32) -> (i32, i32, i32) {
    %c0_i32 = arith.constant 0 : i32
    %c0_i32_0 = arith.constant 0 : i32
    %c0_i32_1 = arith.constant 0 : i32
    return %arg1, %c0_i32, %c0_i32_0 : i32, i32, i32
  }
  func.func @transform_7(%arg0: i32, %arg1: i32) -> (i32, i32, i32) {
    %c0_i32 = arith.constant 0 : i32
    %c0_i32_0 = arith.constant 0 : i32
    %c0_i32_1 = arith.constant 0 : i32
    return %arg1, %c0_i32, %c0_i32_0 : i32, i32, i32
  }
  func.func @transform_8(%arg0: i32, %arg1: i32) -> (i32, i32, i32) {
    %c0_i32 = arith.constant 0 : i32
    %c0_i32_0 = arith.constant 0 : i32
    %c0_i32_1 = arith.constant 0 : i32
    return %arg1, %c0_i32, %c0_i32_0 : i32, i32, i32
  }
  func.func @transform_9(%arg0: i32, %arg1: i32) -> (i32, i32, i32) {
    %c0_i32 = arith.constant 0 : i32
    %c0_i32_0 = arith.constant 0 : i32
    %c0_i32_1 = arith.constant 0 : i32
    return %arg1, %c0_i32, %c0_i32_0 : i32, i32, i32
  }
  func.func @transform_10(%arg0: i32, %arg1: i32) -> (i32, i32, i32) {
    %c0_i32 = arith.constant 0 : i32
    %c0_i32_0 = arith.constant 0 : i32
    %c0_i32_1 = arith.constant 0 : i32
    return %arg0, %c0_i32, %c0_i32_0 : i32, i32, i32
  }
}

</mosaic_0001>

<bundles_post_ra>
// kernel: tpu_custom_call.1
= control target key start
LH: loop header
LB: loop body
LE: loop exit
PB: predicated region body
PF: predicated region fallthrough
CT: control target
= control target key end

     0   :  { %s2078_s0 = inlined_call_operand.vmem [shape: f32[2,8,32], index: 0, kind: input, shape index: {}]   ;;  %s2079_s1 = inlined_call_operand.vmem [shape: f32[2,1,8], index: 1, kind: input, shape index: {}]   ;;  %s2080_s2 = inlined_call_operand.vmem [shape: bf16[2,8,8], index: 2, kind: input, shape index: {}]   ;;  %s2081_s3 = inlined_call_operand.vmem [shape: bf16[2,8,8], index: 3, kind: input, shape index: {}]   ;;  %s2082_s4 = inlined_call_operand.vmem [shape: bf16[2,8,8], index: 4, kind: input, shape index: {}]   ;;  %s2083_s5 = inlined_call_operand.vmem [shape: bf16[2,32,32], index: 5, kind: input, shape index: {}]   ;;  %s2084_s6 = inlined_call_operand.vmem [shape: bf16[2,32,128], index: 6, kind: input, shape index: {}]   ;;  %s2085_s7 = inlined_call_operand.vmem [shape: bf16[2,128,32], index: 7, kind: input, shape index: {}]   ;;  %s2086_s8 = inlined_call_operand.vmem [shape: f32[2,6,32], index: 8, kind: input, shape index: {}]   ;;  %s2087_s9 = inlined_call_operand.vmem [shape: f32[2,1,128], index: 9, kind: input, shape index: {}]   ;;  %s2088_s10 = inlined_call_operand.hbm [shape: f32[2,8,32], index: 10, kind: output, shape index: {}]  }
   0x1   :  { %2103 = sst [smem:[#allocation18_spill]] %s2078_s0 }
   0x2   :  { %2104 = sst [smem:[#allocation19_spill]] %s2080_s2 }
   0x3   :  { %2105 = sst [smem:[#allocation20_spill]] %s2081_s3 }
   0x4   :  { %2106 = sst [smem:[#allocation21_spill]] %s2083_s5 }
   0x5   :  { %2107 = sst [smem:[#allocation22_spill]] %s2088_s10 }
   0x6   :  { %15 = vsyncpa [#allocation4], 0 }
   0x7   :  { %17 = vsyncpa [#allocation4 + $0x1], 0  ;;  %s1763_s13 = smov 0   ;;  %s1765_s14 = smov 0  }
   0x8   :  { %s1767_s15 = smov 0   ;;  %s1769_s16 = smov 0  }
   0x9   :  { %s1771_s17 = smov 0   ;;  %s1773_s18 = smov 0  }
   0xa   :  { %s1775_s19 = smov 0   ;;  %s1777_s20 = smov 0  }
   0xb LB: > { %2108 = sst [smem:[#allocation6_spill]] %s1674_s13  ;;  %s1408_s21 = sadd.s32 4294967295, %s1702_s20   ;;  %s1702_s20 = sphi %s1777_s20, %s23_s20   ;;  %s1698_s19 = sphi %s1775_s19, %s2143_s19   ;;  %s1694_s18 = sphi %s1773_s18, %s2142_s18   ;;  %s1690_s17 = sphi %s1771_s17, %s2141_s17   ;;  %s1686_s16 = sphi %s1769_s16, %s2140_s16   ;;  %s1682_s15 = sphi %s1767_s15, %s2139_s15   ;;  %s1678_s14 = sphi %s1765_s14, %s2138_s14   ;;  %s1674_s13 = sphi %s1763_s13, %s2137_s13  }
   0xc   : > { %2109 = sst [smem:[#allocation7_spill]] %s1678_s14  ;;  %s1409_s22 = sadd.s32 4294967294, %s1702_s20  }
   0xd   : > { %2110 = sst [smem:[#allocation8_spill]] %s1682_s15  ;;  %s32_s23 = sadd.s32 1, %s1694_s18 }
   0xe   : > { %2111 = sst [smem:[#allocation9_spill]] %s1690_s17  ;;  %p33_p0 = scmp.ge.s32.totalorder %s32_s23, 2 }
   0xf   : > { %2112 = sst [smem:[#allocation10_spill]] %s1694_s18  ;;  %s35_s24 = sadd.s32 1, %s1698_s19 }
  0x10   : > { %2113 = sst [smem:[#allocation11_spill]] %s1698_s19  ;;  %p312_p1 = scmp.ne.s32.totalorder %s1682_s15, %s1678_s14 }
  0x11   : > { %2114 = sst [smem:[#allocation12_spill]] %s1702_s20  ;;  %p313_p2 = scmp.eq.s32.totalorder %s1408_s21, 3 }
  0x12   : > { %s2145_s23 = smov (%p33_p0, %s32_s23), 0  ;;  %s2147_s24 = smov (!%p33_p0, %s35_s24), %s1698_s19 }
  0x13   : > { %2115 = sst [smem:[#allocation13_spill]] %s2145_s23  ;;  %p1812_p3 = por %p313_p2, %p312_p1 }
  0x14   : > { %p318_p4 = scmp.ne.s32.totalorder %s1678_s14, %s1674_s13  ;;  %p37_p5 = scmp.ge.s32.totalorder %s2147_s24, 2 }
  0x15   : > { %s2116_s25 = scalar_select %p1812_p3, 1, 0 }
  0x16   : > { %p319_p6 = scmp.eq.s32.totalorder %s1409_s22, 3  ;;  %p1412_p7 = scmp.ge.s32.totalorder %s1702_s20, 1 }
  0x17   : > { %2117 = sst [smem:[#allocation14_spill]] %s2116_s25  ;;  %p408_p8 = scmp.lt.s32.totalorder %s1702_s20, 5 }
  0x18   : > { %s2149_s24 = smov (%p37_p5, %s2147_s24), 0  ;;  %p1822_p9 = por %p319_p6, %p318_p4 }
  0x19   : > { %2118 = sst [smem:[#allocation15_spill]] %s2149_s24  ;;  %p409_p10 = pnand %p1412_p7, %p408_p8 }
  0x1a   : > { %s2119_s26 = scalar_select %p1822_p9, 1, 0 }
  0x1b   : > { %s299_s27 = ssub.s32 %s1698_s19, %s2149_s24  ;;  %s302_s28 = sadd.s32 1, %s1682_s15 }
  0x1c   : > { %2120 = sst [smem:[#allocation16_spill]] %s2119_s26  ;;  %p300_p11 = scmp.eq.s32.totalorder %s299_s27, 0 }
  0x1d   : > { %412 = sbr.rel (%p409_p10) target bundleno = 3300 (0xce4), region = 60  ;;  %s2090_s30 = sand.u32 (!%p409_p10), 1, %s1678_s14  }
  0x1e   : > { %s1830_s29 = scalar_select %p300_p11, %s1682_s15, %s302_s28  }
  0x1f   : > { %p482_p12 = scmp.lt.s32.totalorder (!%p409_p10), %s1690_s17, 1  ;;  %s1836_s11 = sshll.u32 (!%p409_p10), %s2090_s30, 3 }
  0x20   : > { %2121 = sst [smem:[#allocation17_spill]] %s1830_s29  ;;  %p489_p13 = scmp.lt.s32.totalorder (!%p409_p10), %s1686_s16, 1 }
  0x21   : > { %s2122_s0 = sld [smem:[#allocation18_spill]] (!%p409_p10)  ;;  %p1425_p0 = scmp.ne.s32.totalorder (!%p409_p10), %s1686_s16, 0 }
  0x22   : > { %s1840_s12 = scalar_select %p482_p12, %s1690_s17, 1 }
  0x23   : > { %s1843_s21 = scalar_select %p489_p13, %s1686_s16, 1 }
  0x24   : > { %s1414_s22 = sshll.u32 %s1840_s12, 3  ;;  %s2123_s2 = sld [smem:[#allocation19_spill]] }
  0x25   : > { %s1854_s18 = sshll.u32 %s1843_s21, 2  ;;  %s2124_s3 = sld [smem:[#allocation20_spill]] }
  0x26   : > { %s1496_s24 = sshll.u32 %s1843_s21, 4  ;;  %s2125_s5 = sld [smem:[#allocation21_spill]] }
  0x27   : > { %s485_s19 = scalar_lea.vmem %s2122_s0, %s1414_s22  ;;  %s1877_s15 = scalar_lea.vmem %s2084_s6, %s1496_s24 }
  0x28   : > { %s1498_s29 = sshll.u32 %s1843_s21, 6 }
  0x29   : > { %s1884_s20 = scalar_lea.vmem %s2085_s7, %s1498_s29  ;;  %527 = sbr.rel (%p1425_p0) target bundleno = 48 (0x30), region = 64 }
  0x2a   : > { %s492_s26 = scalar_lea.vmem %s2123_s2, %s1854_s18  ;;  %s1424_s2 = sshll.u32 %s1843_s21, 3 }
  0x2b   : > { %s496_s10 = scalar_lea.vmem %s2124_s3, %s1854_s18  ;;  %s1889_s28 = scalar_lea.vmem %s2086_s8, %s1424_s2 }
  0x2c   : > { %s1872_s22 = scalar_lea.vmem %s2125_s5, %s1496_s24  ;;  %s522_s3 = scalar_lea.vmem %s2087_s9, %s1843_s21 }
  0x2d   : > { %s481_s5 = scalar_lea.vmem [#allocation3], %s1836_s11 }
  0x2e   : > { %v528_v0 = vld [vmem:[%s485_s19] sm:$0xff]  ;;  %vm529_vm0 = vcmask 261120  }
  0x2f   : > { %530 = vst.msk [vmem:[#allocation2] sm:$0xff] %vm529_vm0, %v528_v0 }
  0x30 PF: > { %v535_v1 = vld [vmem:[%s496_s10] sm:$0xf]  ;;  %vm547_vm1 = vcmask 1043456   ;;  %vm543_vm2 = vcmask 64512   ;;  %s2126_s10 = scalar_lea.vmem %s2082_s4, %s1854_s18  ;;  %s2127_s19 = scalar_lea.vmem %s2079_s1, %s1840_s12  ;;  %vm1035_vm3 = vcmask 261120  }
  0x31   : > { %v1900_v3 = vsel %vm547_vm1, %v535_v1, 0  ;;  %v534_v5 = vld [vmem:[%s492_s26] sm:$0xf]  ;;  %s1704_s18 = smov 120   ;;  %s1705_s24 = smov 112  }
  0x32   : > { %574 = vmatpush.bf16.msra.mxu2 %v1900_v3  ;;  %v1906_v6 = vsel %vm547_vm1, %v534_v5, 0  ;;  %v536_v14 = vld [vmem:[%s2126_s10] sm:$0xf]  ;;  %s1706_s26 = smov 104   ;;  %p1491_p1 = scmp.ne.s32.totalorder %s1686_s16, 1 }
  0x33   : > { %558 = vmatpush.bf16.msra.mxu0 %v1906_v6  ;;  %v1920_v15 = vsel %vm547_vm1, %v536_v14, 0  ;;  %v1930_v16 = vld [vmem:[%s2127_s19] ss:$0 sm:$0xff] }
  0x34   : > { %v537_v38 = vld [vmem:[%s1872_s22] sm:$0xf] }
  0x35   : > { %v658_v39 = vsel %vm547_vm1, %v537_v38, 0 }
  0x36   : > { %v1897_v2 = vld [vmem:[#allocation2] sm:$0xff]  ;;  %590 = vmatpush.bf16.msrb.mxu2 %v1920_v15  ;;  %667 = vmatpush.bf16.msra.mxu1 %v658_v39 }
  0x37   : > { %v533_v4 = vpack.c.bf16 %v1897_v2, %v1897_v2 }
  0x39   : > { %1427 = vmatmul.msk.bf16.vlgmr.msra.gmra.mxu2 %vm543_vm2, %v533_v4  ;;  %1426 = vmatmul.msk.bf16.vlgmr.msra.gmra.mxu0 %vm543_vm2, %v533_v4  ;;  %v676_v22 = vunpack.c.l.b16 %v533_v4 }
  0x3a   : > { %690 = vmatpush.bf16.msra.mxu2 %v1906_v6 }
  0x3b   : > { %v1934_v23 = vpack.c.b16 %v676_v22, %v676_v22 }
  0x3d   : > { %678 = vrot.lane.b32.xlu1 %v1934_v23, %s1704_s18 }
  0x49   : > { %1428 = vmatmul.msk.bf16.vlgmr.msrb.gmra.mxu2 %vm543_vm2, %v533_v4  ;;  %v538_v4 = vld [vmem:[%s1872_s22 + $0x4] sm:$0xf] }
  0x4a   : > { %v781_v5 = vsel %vm547_vm1, %v538_v4, 0 }
  0xaf   : > { %v679_v32 = vpop.permute.xlu1 %678 }
  0xb0   : > { %1432 = vmatmul.msk.bf16.vlgmr.msra.gmra.mxu2 %vm543_vm2, %v679_v32 }
  0xb6   : > { %v560_v7 = vpop.f32.mrf.mxu0 }
  0xb7   : > { %v596_v12 = vpack.c.bf16 %v560_v7, %v560_v7 }
  0xbc   : > { %v576_v8 = vpop.f32.mrf.mxu2 }
  0xbd   : > { %v597_v9 = vpack.c.bf16 %v576_v8, %v576_v8 }
  0xbe   : > { %v562_v11 = vpop.f32.mrf.mxu0 }
  0xbf   : > { %v605_v10 = vsel %vm543_vm2, %v597_v9, 0 }
  0xc0   : > { %614 = vmatpush.bf16.xpose.msra.mxu3 %v605_v10 }
  0xc4   : > { %v578_v13 = vpop.f32.mrf.mxu2 }
  0xc7   : > { %1429 = vmatmul.msk.bf16.vlgmr.msra.gmra.mxu3 %vm543_vm2, %v596_v12 }
  0xc8   : > { %703 = vmatpush.bf16.msrb.mxu3 %v1900_v3 }
  0xcc   : > { %v592_v24 = vpop.f32.mrf.mxu2  ;;  %790 = vmatpush.bf16.msra.mxu3 %v781_v5 }
  0xcd   : > { %v633_v31 = vpack.c.bf16 %v592_v24, %v592_v24 }
  0xcf   : > { %v638_v33 = vsel %vm547_vm1, %v633_v31, 0 }
  0xd0   : > { %647 = vmatpush.bf16.msrb.mxu0 %v638_v33 }
  0xd4   : > { %v594_v25 = vpop.f32.mrf.mxu2  ;;  %716 = vmatpush.bf16.msra.mxu0 %v1920_v15 }
  0xd7   : > { %1433 = vmatmul.msk.bf16.vlgmr.msrb.gmra.mxu3 %vm543_vm2, %v679_v32 }
 0x133   : > { %v692_v40 = vpop.f32.mrf.mxu2 }
 0x134   : > { %v722_v50 = vpack.c.bf16 %v692_v40, %v692_v40 }
 0x13b   : > { %v694_v43 = vpop.f32.mrf.mxu2 }
 0x14a   : > { %v616_v17 = vpop.f32.mrf.mxu3 }
 0x14b   : > { %v617_v18 = vadd.f32 %v1930_v16, %v616_v17 }
 0x14d   : > { %v620_v19 = vmul.f32 0.17677669, %v617_v18 }
 0x14f   : > { %v621_v20 = vsel %vm543_vm2, %v620_v19, -inf }
 0x150   : > { %622 = vmax.xlane.f32.xlu0 %v621_v20 }
 0x152   : > { %v618_v21 = vpop.f32.mrf.mxu3 }
 0x15a   : > { %v705_v41 = vpop.f32.mrf.mxu3 }
 0x15b   : > { %v723_v42 = vpack.c.bf16 %v705_v41, %v705_v41 }
 0x15d   : > { %v728_v45 = vsel %vm543_vm2, %v723_v42, 0 }
 0x15e   : > { %737 = vmatpush.bf16.xpose.msrb.mxu1 %v728_v45 }
 0x162   : > { %v707_v44 = vpop.f32.mrf.mxu3 }
 0x1c3   : > { %v623_v26 = vpop.xlane.xlu0 %622 }
 0x1c4   : > { %v624_v27 = vsub.f32 %v620_v19, %v623_v26 }
 0x1c6   : > { %v625_v28 = vmul.f32 1.442695, %v624_v27 }
 0x1c8   : > { %1586 = vpow2.f32 %v625_v28  ;;  %v1971_v28 = vld [vmem:[%s1889_s28] sm:$0x3f] }
 0x1ce   : > { %v1587_v29 = vpop.eup %1586 }
 0x1cf   : > { %v627_v30 = vsel %vm543_vm2, %v1587_v29, 0.0 }
 0x1d0   : > { %628 = vadd.xlane.f32.xlu0 %v627_v30 }
 0x243   : > { %v629_v34 = vpop.xlane.xlu0 %628 }
 0x244   : > { %1588 = vrcp.f32 %v629_v34 }
 0x24a   : > { %v1589_v35 = vpop.eup %1588 }
 0x24b   : > { %v631_v36 = vmul.f32 %v1589_v35, %v1587_v29  ;;  %v673_v29 = vperm.slane %v1971_v28, 0 }
 0x24d   : > { %v632_v37 = vpack.c.bf16 %v631_v36, %v631_v36 }
 0x24f   : > { %1430 = vmatmul.msk.bf16.vlgmr.msrb.gmra.mxu0 %vm543_vm2, %v632_v37 }
 0x250   : > { %809 = vmatpush.bf16.msrb.mxu0 %v1906_v6 }
 0x25f   : > { %1434 = vmatmul.msk.bf16.vlgmr.msra.gmra.mxu0 %vm543_vm2, %v679_v32 }
 0x2cc   : > { %v649_v46 = vpop.f32.mrf.mxu0 }
 0x2cd   : > { %v653_v47 = vpack.c.bf16 %v649_v46, %v649_v46 }
 0x2cf   : > { %1431 = vmatmul.msk.bf16.vlgmr.msra.gmra.mxu1 %vm543_vm2, %v653_v47  ;;  %v539_v47 = vld [vmem:[%s1872_s22 + $0x8] sm:$0xf] }
 0x2d0   : > { %822 = vmatpush.bf16.msra.mxu1 %v1900_v3 }
 0x2d4   : > { %v651_v48 = vpop.f32.mrf.mxu0 }
 0x2d5   : > { %v900_v48 = vsel %vm547_vm1, %v539_v47, 0 }
 0x2dc   : > { %v718_v49 = vpop.f32.mrf.mxu0 }
 0x2dd   : > { %v756_v51 = vpack.c.bf16 %v718_v49, %v718_v49 }
 0x2df   : > { %v761_v52 = vsel %vm547_vm1, %v756_v51, 0  ;;  %1435 = vmatmul.msk.bf16.vlgmr.msrb.gmra.mxu1 %vm543_vm2, %v722_v50 }
 0x2e0   : > { %770 = vmatpush.bf16.msrb.mxu2 %v761_v52  ;;  %909 = vmatpush.bf16.msrb.mxu1 %v900_v48  ;;  %v1505_v48 = vld [vmem:[%s1884_s20 + $0x20] sm:$0xff] }
 0x2e4   : > { %835 = vmatpush.bf16.msra.mxu2 %v1920_v15  ;;  %v720_v53 = vpop.f32.mrf.mxu0 }
 0x34c   : > { %v669_v54 = vpop.f32.mrf.mxu1 }
 0x34d   : > { %v674_v30 = vadd.f32 %v673_v29, %v669_v54  ;;  %v1707_v29 = vmov 32.0  }
 0x354   : > { %v671_v55 = vpop.f32.mrf.mxu1 }
 0x35c   : > { %v739_v56 = vpop.f32.mrf.mxu1 }
 0x35d   : > { %v740_v57 = vadd.f32 %v1930_v16, %v739_v56 }
 0x35f   : > { %v743_v58 = vmul.f32 0.17677669, %v740_v57 }
 0x361   : > { %v744_v59 = vsel %vm543_vm2, %v743_v58, -inf }
 0x362   : > { %745 = vmax.xlane.f32.xlu1 %v744_v59 }
 0x364   : > { %v741_v60 = vpop.f32.mrf.mxu1 }
 0x3d5   : > { %v746_v61 = vpop.xlane.xlu1 %745 }
 0x3d6   : > { %v747_v62 = vsub.f32 %v743_v58, %v746_v61 }
 0x3d8   : > { %v748_v63 = vmul.f32 1.442695, %v747_v62 }
 0x3da   : > { %1590 = vpow2.f32 %v748_v63 }
 0x3e0   : > { %v1591_v0 = vpop.eup %1590 }
 0x3e1   : > { %v750_v1 = vsel %vm543_vm2, %v1591_v0, 0.0 }
 0x3e2   : > { %751 = vadd.xlane.f32.xlu2 %v750_v1 }
 0x3fa   : > { %797 = vrot.lane.b32.xlu2 %v1934_v23, %s1705_s24 }
 0x455   : > { %v752_v7 = vpop.xlane.xlu2 %751 }
 0x456   : > { %1592 = vrcp.f32 %v752_v7 }
 0x45c   : > { %v1593_v8 = vpop.eup %1592 }
 0x45d   : > { %v754_v9 = vmul.f32 %v1593_v8, %v1591_v0  ;;  %v798_v10 = vpop.permute.xlu2 %797 }
 0x45e   : > { %1438 = vmatmul.msk.bf16.vlgmr.msrb.gmra.mxu0 %vm543_vm2, %v798_v10  ;;  %1439 = vmatmul.msk.bf16.vlgmr.msra.gmra.mxu1 %vm543_vm2, %v798_v10 }
 0x45f   : > { %v755_v11 = vpack.c.bf16 %v754_v9, %v754_v9 }
 0x461   : > { %1436 = vmatmul.msk.bf16.vlgmr.msrb.gmra.mxu2 %vm543_vm2, %v755_v11 }
 0x462   : > { %928 = vmatpush.bf16.msrb.mxu2 %v1906_v6 }
 0x471   : > { %1440 = vmatmul.msk.bf16.vlgmr.msra.gmra.mxu2 %vm543_vm2, %v798_v10 }
 0x4db   : > { %v811_v12 = vpop.f32.mrf.mxu0  ;;  %v824_v13 = vpop.f32.mrf.mxu1 }
 0x4dc   : > { %v842_v14 = vpack.c.bf16 %v824_v13, %v824_v13  ;;  %v841_v6 = vpack.c.bf16 %v811_v12, %v811_v12 }
 0x4de   : > { %v847_v17 = vsel %vm543_vm2, %v842_v14, 0  ;;  %v540_v14 = vld [vmem:[%s1872_s22 + $0xc] sm:$0xf] }
 0x4df   : > { %856 = vmatpush.bf16.xpose.msrb.mxu3 %v847_v17  ;;  %v1019_v17 = vsel %vm547_vm1, %v540_v14, 0 }
 0x4e3   : > { %v813_v18 = vpop.f32.mrf.mxu0  ;;  %v826_v19 = vpop.f32.mrf.mxu1 }
 0x4e4   : > { %v772_v20 = vpop.f32.mrf.mxu2 }
 0x4e5   : > { %v776_v21 = vpack.c.bf16 %v772_v20, %v772_v20 }
 0x4e7   : > { %1437 = vmatmul.msk.bf16.vlgmr.msra.gmra.mxu3 %vm543_vm2, %v776_v21 }
 0x4e8   : > { %941 = vmatpush.bf16.msra.mxu3 %v1900_v3 }
 0x4ec   : > { %v774_v22 = vpop.f32.mrf.mxu2 }
 0x4f4   : > { %v837_v24 = vpop.f32.mrf.mxu2 }
 0x4f5   : > { %v875_v25 = vpack.c.bf16 %v837_v24, %v837_v24 }
 0x4f7   : > { %v880_v26 = vsel %vm547_vm1, %v875_v25, 0  ;;  %1441 = vmatmul.msk.bf16.vlgmr.msrb.gmra.mxu3 %vm543_vm2, %v841_v6 }
 0x4f8   : > { %889 = vmatpush.bf16.msra.mxu0 %v880_v26  ;;  %1028 = vmatpush.bf16.msrb.mxu3 %v1019_v17 }
 0x4fc   : > { %954 = vmatpush.bf16.msrb.mxu0 %v1920_v15  ;;  %v839_v27 = vpop.f32.mrf.mxu2 }
 0x56a   : > { %v792_v31 = vpop.f32.mrf.mxu3 }
 0x56b   : > { %v796_v32 = vadd.f32 %v792_v31, %v674_v30 }
 0x572   : > { %v794_v3 = vpop.f32.mrf.mxu3 }
 0x57a   : > { %v858_v33 = vpop.f32.mrf.mxu3 }
 0x57b   : > { %v859_v34 = vadd.f32 %v1930_v16, %v858_v33 }
 0x57d   : > { %v862_v35 = vmul.f32 0.17677669, %v859_v34 }
 0x57f   : > { %v863_v36 = vsel %vm543_vm2, %v862_v35, -inf }
 0x580   : > { %864 = vmax.xlane.f32.xlu0 %v863_v36 }
 0x582   : > { %v860_v37 = vpop.f32.mrf.mxu3 }
 0x5f3   : > { %v865_v38 = vpop.xlane.xlu0 %864 }
 0x5f4   : > { %v866_v39 = vsub.f32 %v862_v35, %v865_v38 }
 0x5f6   : > { %v867_v15 = vmul.f32 1.442695, %v866_v39 }
 0x5f8   : > { %1594 = vpow2.f32 %v867_v15  ;;  %v1500_v15 = vld [vmem:[%s1877_s15 + $0x8] sm:$0xff] }
 0x5fe   : > { %v1595_v40 = vpop.eup %1594 }
 0x5ff   : > { %v869_v41 = vsel %vm543_vm2, %v1595_v40, 0.0 }
 0x600   : > { %870 = vadd.xlane.f32.xlu0 %v869_v41 }
 0x614   : > { %916 = vrot.lane.b32.xlu0 %v1934_v23, %s1706_s26 }
 0x673   : > { %v871_v42 = vpop.xlane.xlu0 %870 }
 0x674   : > { %1596 = vrcp.f32 %v871_v42 }
 0x67a   : > { %v1597_v43 = vpop.eup %1596 }
 0x67b   : > { %v873_v44 = vmul.f32 %v1597_v43, %v1595_v40  ;;  %v1499_v40 = vld [vmem:[%s1877_s15] sm:$0xff]  ;;  %v1508_v43 = vld [vmem:[%s1884_s20 + $0x38] sm:$0xff] }
 0x67d   : > { %v874_v45 = vpack.c.bf16 %v873_v44, %v873_v44 }
 0x67f   : > { %1442 = vmatmul.msk.bf16.vlgmr.msra.gmra.mxu0 %vm543_vm2, %v874_v45  ;;  %v1507_v45 = vld [vmem:[%s1884_s20 + $0x30] sm:$0xff] }
 0x680   : > { %1099 = vmatpush.bf16.msra.mxu0 %v1500_v15 }
 0x684   : > { %1100 = vmatpush.bf16.msra.mxu0 %v1499_v40 }
 0x686   : > { %v917_v46 = vpop.permute.xlu0 %916 }
 0x687   : > { %1444 = vmatmul.msk.bf16.vlgmr.msrb.gmra.mxu2 %vm543_vm2, %v917_v46  ;;  %1445 = vmatmul.msk.bf16.vlgmr.msra.gmra.mxu3 %vm543_vm2, %v917_v46 }
 0x68f   : > { %1446 = vmatmul.msk.bf16.vlgmr.msrb.gmra.mxu0 %vm543_vm2, %v917_v46  ;;  %v1506_v46 = vld [vmem:[%s1884_s20 + $0x28] sm:$0xff] }
 0x6fc   : > { %v891_v49 = vpop.f32.mrf.mxu0 }
 0x6fd   : > { %v895_v23 = vpack.c.bf16 %v891_v49, %v891_v49 }
 0x6ff   : > { %1443 = vmatmul.msk.bf16.vlgmr.msrb.gmra.mxu1 %vm543_vm2, %v895_v23 }
 0x704   : > { %v893_v50 = vpop.f32.mrf.mxu0 }
 0x705   : > { %v1504_v50 = vld [vmem:[%s1884_s20 + $0x18] sm:$0xff] }
 0x70a   : > { %v930_v51 = vpop.f32.mrf.mxu2  ;;  %v943_v52 = vpop.f32.mrf.mxu3 }
 0x70b   : > { %v961_v53 = vpack.c.bf16 %v943_v52, %v943_v52  ;;  %v960_v60 = vpack.c.bf16 %v930_v51, %v930_v51 }
 0x70c   : > { %v956_v54 = vpop.f32.mrf.mxu0 }
 0x70d   : > { %v966_v55 = vsel %vm543_vm2, %v961_v53, 0  ;;  %v994_v56 = vpack.c.bf16 %v956_v54, %v956_v54  ;;  %v1503_v53 = vld [vmem:[%s1884_s20 + $0x10] sm:$0xff] }
 0x70e   : > { %975 = vmatpush.bf16.xpose.msra.mxu1 %v966_v55  ;;  %v1065_v55 = vperm.slane %v1971_v28, 1 }
 0x70f   : > { %v999_v57 = vsel %vm547_vm1, %v994_v56, 0 }
 0x710   : > { %1008 = vmatpush.bf16.msra.mxu2 %v999_v57  ;;  %v1067_v57 = vperm.slane %v1971_v28, 2 }
 0x712   : > { %v932_v58 = vpop.f32.mrf.mxu2  ;;  %v945_v59 = vpop.f32.mrf.mxu3 }
 0x714   : > { %v958_v61 = vpop.f32.mrf.mxu0 }
 0x715   : > { %1447 = vmatmul.msk.bf16.vlgmr.msra.gmra.mxu1 %vm543_vm2, %v960_v60 }
 0x716   : > { %1173 = vmatpush.bf16.msrb.mxu1 %v1508_v43 }
 0x71a   : > { %1174 = vmatpush.bf16.msrb.mxu1 %v1507_v45 }
 0x71e   : > { %1175 = vmatpush.bf16.msrb.mxu1 %v1506_v46 }
 0x722   : > { %1176 = vmatpush.bf16.msrb.mxu1 %v1505_v48 }
 0x726   : > { %1177 = vmatpush.bf16.msrb.mxu1 %v1504_v50 }
 0x72a   : > { %1178 = vmatpush.bf16.msrb.mxu1 %v1503_v53 }
 0x77c   : > { %v911_v62 = vpop.f32.mrf.mxu1 }
 0x77d   : > { %v915_v63 = vadd.f32 %v911_v62, %v796_v32 }
 0x784   : > { %v913_v0 = vpop.f32.mrf.mxu1 }
 0x785   : > { %v1501_v0 = vld [vmem:[%s1884_s20] sm:$0xff] }
 0x792   : > { %v977_v1 = vpop.f32.mrf.mxu1 }
 0x793   : > { %v978_v4 = vadd.f32 %v1930_v16, %v977_v1  ;;  %v1585_v1 = vld [vmem:[%s522_s3] ss:$0 sm:$0xff] }
 0x795   : > { %v981_v5 = vmul.f32 0.17677669, %v978_v4 }
 0x797   : > { %v982_v7 = vsel %vm543_vm2, %v981_v5, -inf }
 0x798   : > { %983 = vmax.xlane.f32.xlu2 %v982_v7 }
 0x79a   : > { %v979_v8 = vpop.f32.mrf.mxu1 }
 0x80b   : > { %v984_v9 = vpop.xlane.xlu2 %983 }
 0x80c   : > { %v985_v10 = vsub.f32 %v981_v5, %v984_v9 }
 0x80e   : > { %v986_v11 = vmul.f32 1.442695, %v985_v10 }
 0x810   : > { %1598 = vpow2.f32 %v986_v11 }
 0x816   : > { %v1599_v12 = vpop.eup %1598 }
 0x817   : > { %v988_v13 = vsel %vm543_vm2, %v1599_v12, 0.0 }
 0x818   : > { %989 = vadd.xlane.f32.xlu1 %v988_v13 }
 0x88b   : > { %v990_v18 = vpop.xlane.xlu1 %989 }
 0x88c   : > { %1600 = vrcp.f32 %v990_v18 }
 0x88d   : > { %1602 = vrcp.f32 %v1707_v29 }
 0x892   : > { %v1601_v16 = vpop.eup %1600 }
 0x893   : > { %v992_v19 = vmul.f32 %v1601_v16, %v1599_v12  ;;  %v1603_v30 = vpop.eup %1602 }
 0x894   : > { %v1040_v31 = vmul.f32 32.0, %v1603_v30  ;;  %vm1044_vm4 = vweird.f32 %v1603_v30 }
 0x895   : > { %v993_v20 = vpack.c.bf16 %v992_v19, %v992_v19 }
 0x896   : > { %v1041_v32 = vsub.f32 1.0, %v1040_v31 }
 0x897   : > { %1448 = vmatmul.msk.bf16.vlgmr.msra.gmra.mxu2 %vm543_vm2, %v993_v20 }
 0x898   : > { %v1042_v3 = vmul.f32 %v1603_v30, %v1041_v32  ;;  %v1210_v32 = vperm.slane %v1971_v28, 4 }
 0x89a   : > { %v1043_v33 = vadd.f32 %v1603_v30, %v1042_v3 }
 0x89c   : > { %v1996_v34 = vsel %vm1044_vm4, %v1603_v30, %v1043_v33  ;;  %v1208_v30 = vperm.slane %v1971_v28, 3 }
 0x91a   : > { %v1010_v21 = vpop.f32.mrf.mxu2 }
 0x91b   : > { %v1014_v22 = vpack.c.bf16 %v1010_v21, %v1010_v21 }
 0x91d   : > { %1449 = vmatmul.msk.bf16.vlgmr.msrb.gmra.mxu3 %vm543_vm2, %v1014_v22 }
 0x922   : > { %v1012_v24 = vpop.f32.mrf.mxu2 }
 0x9a0   : > { %v1030_v6 = vpop.f32.mrf.mxu3 }
 0x9a1   : > { %v1034_v25 = vadd.f32 %v1030_v6, %v915_v63  ;;  %v1502_v63 = vld [vmem:[%s1884_s20 + $0x8] sm:$0xff] }
 0x9a2   : > { %1179 = vmatpush.bf16.msrb.mxu1 %v1502_v63 }
 0x9a3   : > { %v1036_v26 = vsel %vm1035_vm3, %v1034_v25, 0.0 }
 0x9a4   : > { %1037 = vadd.xlane.f32.xlu0 %v1036_v26 }
 0x9a6   : > { %1180 = vmatpush.bf16.msrb.mxu1 %v1501_v0 }
 0x9a8   : > { %v1032_v27 = vpop.f32.mrf.mxu3 }
 0xa17   : > { %v1038_v35 = vpop.xlane.xlu0 %1037 }
 0xa18   : > { %v1046_v36 = vmul.f32 %v1996_v34, %v1038_v35 }
 0xa1a   : > { %v1047_v37 = vsub.f32 %v1034_v25, %v1046_v36 }
 0xa1c   : > { %v1048_v38 = vmul.f32 %v1047_v37, %v1047_v37 }
 0xa1e   : > { %v1049_v39 = vsel %vm1035_vm3, %v1048_v38, 0.0 }
 0xa1f   : > { %1050 = vadd.xlane.f32.xlu1 %v1049_v39 }
 0xa92   : > { %v1051_v41 = vpop.xlane.xlu1 %1050 }
 0xa93   : > { %v1052_v42 = vmul.f32 %v1051_v41, %v1996_v34 }
 0xa95   : > { %v1053_v44 = vadd.f32 1e-05, %v1052_v42 }
 0xa97   : > { %1604 = vrsqrt.f32 %v1053_v44  ;;  %vm1060_vm6 = vweird.f32 %v1053_v44 }
 0xa9d   : > { %v1605_v47 = vpop.eup %1604 }
 0xa9e   : > { %v1055_v49 = vmul.f32 %v1605_v47, %v1053_v44  ;;  %vm1061_vm5 = vweird.f32 %v1605_v47 }
 0xa9f   : > { %vm1062_vm7 = vmor %vm1060_vm6, %vm1061_vm5 }
 0xaa0   : > { %v1056_v23 = vmul.f32 %v1605_v47, %v1055_v49 }
 0xaa2   : > { %v1057_v51 = vmul.f32 0.5, %v1056_v23 }
 0xaa4   : > { %v1058_v52 = vsub.f32 1.5, %v1057_v51 }
 0xaa6   : > { %v1059_v54 = vmul.f32 %v1605_v47, %v1058_v52 }
 0xaa8   : > { %v1063_v56 = vsel %vm1062_vm7, %v1605_v47, %v1059_v54 }
 0xaa9   : > { %v1064_v58 = vmul.f32 %v1063_v56, %v1047_v37 }
 0xaab   : > { %v1066_v59 = vmul.f32 %v1065_v55, %v1064_v58 }
 0xaad   : > { %v1068_v60 = vadd.f32 %v1067_v57, %v1066_v59 }
 0xaaf   : > { %v1069_v61 = vadd.f32 %v1068_v60, %v1897_v2  ;;  %v1124_v2 = vperm.slane %v1971_v28, 5 }
 0xab1   : > { %v1070_v62 = vpack.c.bf16 %v1069_v61, %v1069_v61 }
 0xab3   : > { %1458 = vmatmul.msk.bf16.vlgmr.msra.gmra.mxu0 %vm1035_vm3, %v1070_v62 }
 0xb30   : > { %v1102_v4 = vpop.f32.mrf.mxu0 }
 0xb31   : > { %v1103_v5 = vadd.f32 %v1585_v1, %v1102_v4 }
 0xb33   : > { %v1106_v7 = vmax.f32 %v1103_v5, 0.0 }
 0xb35   : > { %v1107_v8 = vpack.c.bf16 %v1106_v7, %v1106_v7 }
 0xb37   : > { %1181 = vmatmul.bf16.vlgmr.msrb.gmra.mxu1 %v1107_v8 }
 0xb38   : > { %v1104_v9 = vpop.f32.mrf.mxu0 }
 0xbb4   : > { %v1182_v10 = vpop.f32.mrf.mxu1 }
 0xbb5   : > { %v1183_v11 = vadd.f32 %v1182_v10, %v1124_v2 }
 0xbb7   : > { %v1186_v12 = vsel %vm1035_vm3, %v1183_v11, 0.0 }
 0xbb8   : > { %1187 = vadd.xlane.f32.xlu1 %v1186_v12 }
 0xbbc   : > { %v1184_v13 = vpop.f32.mrf.mxu1 }
 0xc2b   : > { %v1188_v14 = vpop.xlane.xlu1 %1187 }
 0xc2c   : > { %v1189_v17 = vmul.f32 %v1188_v14, %v1996_v34 }
 0xc2e   : > { %v1190_v18 = vsub.f32 %v1183_v11, %v1189_v17 }
 0xc30   : > { %v1191_v16 = vmul.f32 %v1190_v18, %v1190_v18 }
 0xc32   : > { %v1192_v19 = vsel %vm1035_vm3, %v1191_v16, 0.0 }
 0xc33   : > { %1193 = vadd.xlane.f32.xlu2 %v1192_v19 }
 0xca6   : > { %v1194_v20 = vpop.xlane.xlu2 %1193 }
 0xca7   : > { %v1195_v21 = vmul.f32 %v1194_v20, %v1996_v34 }
 0xca9   : > { %v1196_v22 = vadd.f32 1e-05, %v1195_v21 }
 0xcab   : > { %1606 = vrsqrt.f32 %v1196_v22  ;;  %vm1203_vm9 = vweird.f32 %v1196_v22 }
 0xcb1   : > { %v1607_v24 = vpop.eup %1606 }
 0xcb2   : > { %v1198_v6 = vmul.f32 %v1607_v24, %v1196_v22  ;;  %vm1204_vm8 = vweird.f32 %v1607_v24 }
 0xcb3   : > { %vm1205_vm10 = vmor %vm1203_vm9, %vm1204_vm8 }
 0xcb4   : > { %v1199_v25 = vmul.f32 %v1607_v24, %v1198_v6 }
 0xcb6   : > { %v1200_v26 = vmul.f32 0.5, %v1199_v25 }
 0xcb8   : > { %v1201_v27 = vsub.f32 1.5, %v1200_v26 }
 0xcba   : > { %v1202_v29 = vmul.f32 %v1607_v24, %v1201_v27 }
 0xcbc   : > { %v1206_v31 = vsel %vm1205_vm10, %v1607_v24, %v1202_v29 }
 0xcbd   : > { %v1207_v3 = vmul.f32 %v1206_v31, %v1190_v18 }
 0xcbf   : > { %v1209_v33 = vmul.f32 %v1208_v30, %v1207_v3 }
 0xcc1   : > { %v1211_v35 = vadd.f32 %v1210_v32, %v1209_v33  ;;  %1217 = sbr.rel (%p1491_p1) target bundleno = 3278 (0xcce), region = 68 }
 0xcc3   : > { %v1212_v34 = vadd.f32 %v1211_v35, %v1069_v61 }
 0xcc5   : > { %1213 = vst.msk [vmem:[#allocation2] sm:$0xff] %vm1035_vm3, %v1212_v34 }
 0xccc   : > { %v1218_v36 = vld [vmem:[#allocation2] sm:$0xff] }
 0xccd   : > { %1219 = vst.msk [vmem:[%s481_s5] sm:$0xff] %vm1035_vm3, %v1218_v36 }
 0xcce PF: > { %s2128_s3 = sld [smem:[#allocation9_spill]]  ;;  %s1233_s23 = sshll.u32 %s481_s5, 4  ;;  %s1234_s23 = int_to_ptr.vmem [resolvable:$true] %s1233_s23 }
 0xccf   : > { %s2129_s21 = sld [smem:[#allocation7_spill]] }
 0xcd0   : > { %s2131_s20 = sld [smem:[#allocation22_spill]] }
 0xcd4   : > { %s1493_s15 = sshll.u32 %s2128_s3, 3 }
 0xcd5   : > { %s2133_s30 = sand.u32 1, %s2129_s21  }
 0xcd6   : > { %s2132_s25 = smov %s2131_s20  ;;  %s1231_s27 = scalar_lea.hbm %s2131_s20, %s1493_s15 }
 0xcd7   : > { %s1235_s16 = sshll.u32 %s1231_s27, 4  ;;  %s1221_s0 = scalar_lea.sflag [#allocation4], %s2133_s30  ;;  %s1236_s16 = int_to_ptr.hbm [resolvable:$true] %s1235_s16 }
 0xcd8   : > { %s1622_s2 = sshra.s32 %s1236_s16, 4  ;;  %s1628_s19 = scalar_lea.hbm %s2132_s25, 16  ;;  %s1623_s2 = int_to_ptr.hbm [resolvable:$true] %s1622_s2 }
 0xcd9   : > { %s1624_s10 = scalar_lea.hbm %s1623_s2, 8  ;;  %p1629_p6 = scmp.lt.s32.totalorder %s1623_s2, %s2132_s25 }
 0xcda   : > { %p1625_p2 = scmp.ne.s32.totalorder %s1623_s2, %s1624_s10  ;;  %p1630_p7 = scmp.lt.s32.totalorder %s1628_s19, %s1624_s10 }
 0xcdc   : > { %p1626_p4 = pnand %p1625_p2, %p1812_p3  ;;  %p1631_p8 = por %p1630_p7, %p1629_p6 }
 0xcde   : > { %p1627_p5 = pneg %p1626_p4 }
 0xce0   : > { %p1632_p10 = pnand %p1631_p8, %p1627_p5 }
 0xce2   : > { %1635 = shalt.err (!%p1632_p10)
}
 0xce3   : > { %1509 = dma.vmem_to_hbm [thread:$0]  (%p1812_p3), %s1234_s23, 128, %s1236_s16, %s1221_s0  }
 0xce4 PF: > { %s2134_s5 = sld [smem:[#allocation12_spill]] }
 0xce5   : > { %s2135_s11 = sld [smem:[#allocation6_spill]] }
 0xcea   : > { %p1515_p11 = scmp.ge.s32.totalorder %s2134_s5, 2 }
 0xceb   : > { %s1247_s12 = sand.u32 1, %s2135_s11  }
 0xcec   : > { %p1512_p12 = pnand %p1515_p11, %p1822_p9  ;;  %s1248_s28 = scalar_lea.sflag [#allocation4], %s1247_s12 }
 0xcee   : > { %p1513_p13 = pneg %p1512_p12 }
 0xcf0   : > { %1669 = dma.done.wait (%p1513_p13), %s1248_s28, 128  }
 0xcf1   : > { %1671 = vsyncadd (%p1513_p13), %s1248_s28, 4294967168  ;;  %s23_s20 = sadd.s32 1, %s2134_s5   ;;  %s2137_s13 = sld [smem:[#allocation7_spill]] }
 0xcf2   : > { %p20_p0 = scmp.ge.s32.totalorder %s23_s20, 6   ;;  %s2138_s14 = sld [smem:[#allocation8_spill]] }
 0xcf3   : > { %s2139_s15 = sld [smem:[#allocation17_spill]] }
 0xcf4   : > { %s2140_s16 = sld [smem:[#allocation10_spill]]  ;;  %22 = sbr.rel (!%p20_p0) target bundleno = 11 (0xb), region = 130 }
 0xcf5   : > { %s2141_s17 = sld [smem:[#allocation11_spill]] }
 0xcf6   : > { %s2142_s18 = sld [smem:[#allocation13_spill]] }
 0xcf7   : > { %s2143_s19 = sld [smem:[#allocation15_spill]] }
 0xcf9   :  { %1254 = vsyncpa [#allocation4], 1 }
 0xcfa   :  { %1256 = vsyncpa [#allocation4 + $0x1], 1 }

</bundles_post_ra>
